<compile_context>
chip_gen: v7x
topology: tpu7x:2x2x1
jax: 0.10.0
libtpu: 0.0.40
codegen_flags: <defaults>
</compile_context>

<pallas_src>
import jax
import jax.numpy as jnp
from jax.experimental import pallas as pl
from jax.experimental.pallas import tpu as pltpu


def cablock_kernel(x_ref, w_ref, b_ref, o_ref):
    # x_ref block: (TB, C, HW) -- channels on sublanes, spatial on lanes.
    x = x_ref[...]                                                   # (TB, C, HW)
    pooled = jnp.sum(x, axis=2, keepdims=True)                       # (TB, C, 1); 1/HW folded into w
    att = jnp.einsum(
        'oc,bcj->boj', w_ref[...], pooled,
        preferred_element_type=jnp.float32) + b_ref[...]             # (TB, C, 1) 1x1 conv
    o_ref[...] = (x * att).astype(o_ref.dtype)                       # channel-attention scale


def _pick_batch_tile(N, C, HW, dtype_bytes=4, vmem_budget=8 << 20):
    """Largest batch tile TB such that the double-buffered in+out working set
    fits the VMEM budget and (when N>=2) the grid keeps >=2 steps for megacore."""
    per_image = C * HW * dtype_bytes
    max_tb = max(1, vmem_budget // (4 * per_image))   # 2 bufs x (in + out)
    target_steps = 2 if N >= 2 else 1
    tb = 1
    for cand in range(1, N + 1):
        if N % cand == 0 and cand <= max_tb and N // cand >= target_steps:
            tb = cand
    return tb


def cablock_pallas(x_nchw, w, b):
    """x_nchw: (N, C, H, W) f32; w: (C_out, C_in) conv-1x1 weight; b: (C_out, 1) bias."""
    N, C, H, W = x_nchw.shape
    HW = H * W
    x3 = x_nchw.reshape(N, C, HW)        # contiguous reshape: no transpose, no extra HBM pass
    w_scaled = (w * (1.0 / HW)).astype(jnp.float32)   # fold avg-pool normalization into the conv

    TB = _pick_batch_tile(N, C, HW, dtype_bytes=x3.dtype.itemsize)

    grid_spec = pltpu.PrefetchScalarGridSpec(
        num_scalar_prefetch=0,
        grid=(N // TB,),
        in_specs=[
            pl.BlockSpec((TB, C, HW), lambda n: (n, 0, 0)),
            pl.BlockSpec((C, C), lambda n: (0, 0)),
            pl.BlockSpec((C, 1), lambda n: (0, 0)),
        ],
        out_specs=pl.BlockSpec((TB, C, HW), lambda n: (n, 0, 0)),
    )
    out = pl.pallas_call(
        cablock_kernel,
        out_shape=jax.ShapeDtypeStruct((N, C, HW), x_nchw.dtype),
        grid_spec=grid_spec,
        compiler_params=pltpu.CompilerParams(dimension_semantics=("parallel",)),
    )(x3, w_scaled, b)
    return out.reshape(N, C, H, W)


def cablock_ref(x_nchw, w, b):
    # Independent plain-JAX reference: AdaptiveAvgPool2d(1) -> Conv2d(C, C, 1) -> scale.
    pooled = jnp.mean(x_nchw, axis=(2, 3), keepdims=True)             # (N, C, 1, 1)
    att = jnp.einsum('ncij,oc->noij', pooled, w) + b.reshape(1, -1, 1, 1)
    return x_nchw * att


if __name__ == "__main__":
    N, C, H, W = 2, 4, 16, 16
    key = jax.random.PRNGKey(0)
    kx, kw, kb = jax.random.split(key, 3)
    x = jax.random.normal(kx, (N, C, H, W), jnp.float32)
    # Conv2d(C, C, 1) weight in matmul form (C_out, C_in); bias as a (C, 1) column.
    w = jax.random.normal(kw, (C, C), jnp.float32) * 0.2
    b = jax.random.normal(kb, (C, 1), jnp.float32) * 0.05

    out = cablock_pallas(x, w, b)
    out = jax.block_until_ready(out)
    assert out.shape == (N, C, H, W)

    ref = cablock_ref(x, w, b)
    if not jnp.allclose(out, ref, atol=1e-5, rtol=1e-5):
        max_err = float(jnp.max(jnp.abs(out - ref)))
        raise AssertionError(f"Pallas/reference mismatch, max abs err = {max_err}")

    print("KERNEL_OK")
</pallas_src>

<mosaic_0001>
module attributes {stable_mosaic.version = 11 : i64} {
  func.func @cablock_kernel(%arg0: i32, %arg1: memref<1x4x256xf32, #tpu.memory_space<vmem>>, %arg2: memref<4x4xf32, #tpu.memory_space<vmem>>, %arg3: memref<4x1xf32, #tpu.memory_space<vmem>>, %arg4: memref<1x4x256xf32, #tpu.memory_space<vmem>>) attributes {dimension_semantics = [#tpu.dimension_semantics<parallel>], iteration_bounds = array<i64: 2>, scalar_prefetch = 0 : i64, scratch_operands = 0 : i64, tpu.core_type = #tpu.core_type<tc>, window_params = [{transform_indices = @transform_0, window_bounds = array<i64: 1, 4, 256>}, {pipeline_mode = #tpu.pipeline_mode<synchronous>, transform_indices = @transform_1, window_bounds = array<i64: 4, 4>}, {pipeline_mode = #tpu.pipeline_mode<synchronous>, transform_indices = @transform_2, window_bounds = array<i64: 4, 1>}, {transform_indices = @transform_3, window_bounds = array<i64: 1, 4, 256>}]} {
    %c0 = arith.constant 0 : index
    %c0_0 = arith.constant 0 : index
    %c0_1 = arith.constant 0 : index
    %0 = vector.load %arg1[%c0, %c0_0, %c0_1] : memref<1x4x256xf32, #tpu.memory_space<vmem>>, vector<1x4x256xf32>
    %cst = arith.constant dense<0.000000e+00> : vector<1x4xf32>
    %1 = vector.multi_reduction <add>, %0, %cst [2] : vector<1x4x256xf32> to vector<1x4xf32>
    %2 = vector.shape_cast %1 : vector<1x4xf32> to vector<1x4x1xf32>
    %c0_2 = arith.constant 0 : index
    %c0_3 = arith.constant 0 : index
    %3 = vector.load %arg2[%c0_2, %c0_3] : memref<4x4xf32, #tpu.memory_space<vmem>>, vector<4x4xf32>
    "tpu.trace_start"() <{level = 10 : i32, message = "oc,bcj->boj"}> : () -> ()
    %cst_4 = arith.constant dense<0.000000e+00> : vector<1x1x4xf32>
    %4 = tpu.matmul %2, %3, %cst_4 {dimension_numbers = #tpu.dot_dimension_numbers<[1], [1], [0, 2], [0], [0, 0, 0, 2, 1, 0], [], []>} : vector<1x4x1xf32>, vector<4x4xf32>, vector<1x1x4xf32> -> vector<1x1x4xf32>
    %5 = tpu.transpose %4, [0, 2, 1] : vector<1x1x4xf32> -> vector<1x4x1xf32>
    "tpu.trace_stop"() : () -> ()
    %c0_5 = arith.constant 0 : index
    %c0_6 = arith.constant 0 : index
    %6 = vector.load %arg3[%c0_5, %c0_6] : memref<4x1xf32, #tpu.memory_space<vmem>>, vector<4x1xf32>
    %7 = vector.shape_cast %6 : vector<4x1xf32> to vector<1x4x1xf32>
    %8 = arith.addf %5, %7 : vector<1x4x1xf32>
    %9 = vector.broadcast %8 : vector<1x4x1xf32> to vector<1x4x256xf32>
    %10 = arith.mulf %0, %9 : vector<1x4x256xf32>
    %c0_7 = arith.constant 0 : index
    %c0_8 = arith.constant 0 : index
    %c0_9 = arith.constant 0 : index
    %11 = vector.load %arg4[%c0_7, %c0_8, %c0_9] : memref<1x4x256xf32, #tpu.memory_space<vmem>>, vector<1x4x256xf32>
    tpu.vector_store %arg4[%c0_7, %c0_8, %c0_9], %10 {strides = array<i32>} : memref<1x4x256xf32, #tpu.memory_space<vmem>>, vector<1x4x256xf32>,
    return
  }
  func.func @transform_0(%arg0: i32) -> (i32, i32, i32) {
    %c0_i32 = arith.constant 0 : i32
    %c0_i32_0 = arith.constant 0 : i32
    %c0_i32_1 = arith.constant 0 : i32
    return %arg0, %c0_i32, %c0_i32_0 : i32, i32, i32
  }
  func.func @transform_1(%arg0: i32) -> (i32, i32) {
    %c0_i32 = arith.constant 0 : i32
    %c0_i32_0 = arith.constant 0 : i32
    %c0_i32_1 = arith.constant 0 : i32
    return %c0_i32, %c0_i32_0 : i32, i32
  }
  func.func @transform_2(%arg0: i32) -> (i32, i32) {
    %c0_i32 = arith.constant 0 : i32
    %c0_i32_0 = arith.constant 0 : i32
    %c0_i32_1 = arith.constant 0 : i32
    return %c0_i32, %c0_i32_0 : i32, i32
  }
  func.func @transform_3(%arg0: i32) -> (i32, i32, i32) {
    %c0_i32 = arith.constant 0 : i32
    %c0_i32_0 = arith.constant 0 : i32
    %c0_i32_1 = arith.constant 0 : i32
    return %arg0, %c0_i32, %c0_i32_0 : i32, i32, i32
  }
}

</mosaic_0001>

<bundles_post_ra>
// kernel: tpu_custom_call.1
= control target key start
LH: loop header
LB: loop body
LE: loop exit
PB: predicated region body
PF: predicated region fallthrough
CT: control target
= control target key end

     0   :  { %8 = vsyncpa [#allocation3], 0  ;;  %s813_s0 = inlined_call_operand.hbm [shape: f32[2,4,256], index: 0, kind: input, shape index: {}]   ;;  %s814_s1 = inlined_call_operand.vmem [shape: f32[4,4], index: 1, kind: input, shape index: {}]   ;;  %s815_s2 = inlined_call_operand.vmem [shape: f32[4,1], index: 2, kind: input, shape index: {}]   ;;  %s816_s3 = inlined_call_operand.hbm [shape: f32[2,4,256], index: 3, kind: output, shape index: {}]  }
   0x1   :  { %10 = vsyncpa [#allocation3 + $0x1], 0 }
   0x2   :  { %11 = vsyncpa [#allocation4], 0 }
   0x3   :  { %13 = vsyncpa [#allocation4 + $0x1], 0  ;;  %s642_s12 = smov 0   ;;  %s644_s13 = smov 0  }
   0x4   :  { %s646_s14 = smov 0   ;;  %s648_s15 = smov 0  }
   0x5 LB: > { %s663_s16 = sadd.s32 4294967295, %s614_s15   ;;  %s440_s17 = sadd.s32 4294967294, %s614_s15   ;;  %s614_s15 = sphi %s648_s15, %s831_s15   ;;  %s610_s14 = sphi %s646_s14, %s830_s14   ;;  %s606_s13 = sphi %s644_s13, %s829_s13   ;;  %s602_s12 = sphi %s642_s12, %s828_s12  }
   0x6   : > { %s667_s18 = sadd.s32 1, %s614_s15   ;;  %s26_s19 = sadd.s32 1, %s610_s14 }
   0x7   : > { %s23_s20 = ssub.s32 %s614_s15, %s667_s18  ;;  %p33_p0 = scmp.ne.s32.totalorder %s610_s14, %s606_s13 }
   0x8   : > { %p24_p1 = scmp.eq.s32.totalorder %s23_s20, 0  ;;  %p34_p2 = scmp.eq.s32.totalorder %s614_s15, 0 }
   0x9   : > { %p39_p3 = scmp.ne.s32.totalorder %s606_s13, %s602_s12  ;;  %p40_p4 = scmp.eq.s32.totalorder %s663_s16, 0 }
   0xa   : > { %s679_s21 = scalar_select %p24_p1, %s610_s14, %s26_s19  }
   0xb   : > { %p681_p5 = por %p34_p2, %p33_p0  ;;  %p685_p6 = por %p40_p4, %p39_p3 }
   0xc   : > { %p105_p7 = scmp.eq.s32.totalorder %s663_s16, 1  ;;  %p111_p8 = scmp.eq.s32.totalorder %s440_s17, 1 }
   0xd   : > { %p477_p10 = scmp.lt.s32.totalorder %s614_s15, 2  ;;  %s137_s26 = sand.u32 1, %s610_s14  }
   0xe   : > { %p692_p11 = por %p105_p7, %p33_p0  ;;  %p696_p12 = por %p111_p8, %p39_p3 }
   0xf   : > { %s456_s27 = sshll.u32 %s614_s15, 7  ;;  %s443_s28 = sshll.u32 %s137_s26, 3 }
  0x10   : > { %s820_s24 = scalar_select %p692_p11, 1, 0 }
  0x11   : > { %s821_s25 = scalar_select %p696_p12, 1, 0 }
  0x12   : > { %s705_s4 = scalar_lea.hbm %s813_s0, %s456_s27  ;;  %s141_s5 = scalar_lea.vmem [#allocation2], %s443_s28 }
  0x13   : > { %s149_s6 = sshll.u32 %s141_s5, 4  ;;  %p709_p13 = pnand %p477_p10, %p681_p5  ;;  %s713_s6 = int_to_ptr.vmem [resolvable:$true] %s149_s6 }
  0x14   : > { %s138_s8 = scalar_lea.sflag [#allocation3], %s137_s26  ;;  %s518_s9 = scalar_lea.hbm %s705_s4, 128 }
  0x15   : > { %p519_p2 = scmp.ne.s32.totalorder %s705_s4, %s518_s9  ;;  %p520_p3 = pneg %p709_p13 }
  0x16   : > { %s523_s17 = scalar_lea.hbm %s813_s0, 256  ;;  %p524_p5 = scmp.lt.u32.totalorder %s705_s4, %s813_s0 }
  0x17   : > { %p521_p4 = pnand %p520_p3, %p519_p2  ;;  %p525_p8 = scmp.lt.u32.totalorder %s523_s17, %s518_s9 }
  0x18   : > { %p527_p9 = scmp.lt.u32.totalorder %s518_s9, %s705_s4 }
  0x19   : > { %p522_p7 = pneg %p521_p4  ;;  %p526_p10 = por %p525_p8, %p524_p5 }
  0x1b   : > { %p528_p0 = por %p527_p9, %p526_p10 }
  0x1d   : > { %p529_p1 = pnand %p528_p0, %p522_p7 }
  0x1f   : > { %532 = shalt.err (!%p529_p1)
}
  0x20   : > { %s533_s22 = scalar_lea.vmem %s713_s6, 128  ;;  %s616_s26 = smov [#allocation2]  }
  0x21   : > { %p534_p2 = scmp.ne.s32.totalorder %s713_s6, %s533_s22  ;;  %s538_s27 = sshll.u32 %s616_s26, 4  ;;  %s539_s27 = int_to_ptr.vmem [resolvable:$false] %s538_s27 }
  0x22   : > { %s540_s28 = scalar_lea.vmem %s539_s27, 256  ;;  %p541_p11 = scmp.lt.s32.totalorder %s713_s6, %s539_s27 }
  0x23   : > { %p536_p4 = pnand %p534_p2, %p520_p3  ;;  %p542_p5 = scmp.lt.s32.totalorder %s540_s28, %s533_s22 }
  0x25   : > { %p537_p12 = pneg %p536_p4  ;;  %p543_p8 = por %p542_p5, %p541_p11 }
  0x27   : > { %p544_p9 = pnand %p543_p8, %p537_p12 }
  0x29   : > { %547 = shalt.err (!%p544_p9)
}
  0x2a   : > { %472 = dma.hbm_to_vmem [thread:$0]  (!%p709_p13), %s705_s4, 128, %s713_s6, %s138_s8  }
  0x2b   : > { %p823_p0 = scmp.lt.s32.totalorder %s614_s15, 3  ;;  %p824_p1 = scmp.ge.s32.totalorder %s614_s15, 1 }
  0x2d   : > { %p155_p3 = pnand %p824_p1, %p823_p0 }
  0x2e   : > { %s747_s29 = sand.u32 (!%p155_p3), 1, %s606_s13  }
  0x2f   : > { %158 = sbr.rel (%p155_p3) target bundleno = 821 (0x335), region = 32  ;;  %s447_s30 = sshll.u32 (!%p155_p3), %s747_s29, 3 }
  0x30   : > { %s161_s5 = scalar_lea.sflag (!%p155_p3), [#allocation3], %s747_s29  ;;  %s164_s7 = scalar_lea.vmem (!%p155_p3), [#allocation2], %s447_s30 }
  0x36   : > { %593 = dma.done.wait (%p685_p6), %s161_s5, 128  }
  0x37   : > { %595 = vsyncadd (%p685_p6), %s161_s5, 4294967168  ;;  %vm191_vm0 = vcmask 1043456   ;;  %v187_v0 = vld [vmem:[%s164_s7] sm:$0xff]  ;;  %vm230_vm1 = vcmask 31744   ;;  %v617_v6 = vmov 0.0   ;;  %vm618_vm2 = vmmov 0  }
  0x38   : > { %v189_v1 = vcombine.high %v187_v0, %v187_v0  ;;  %v192_v2 = vsel %vm191_vm0, %v187_v0, 0.0  ;;  %v197_v5 = vld [vmem:[%s814_s1] sm:$0xf]  ;;  %460 = vmatprep.subr.mxu0 %v617_v6  ;;  %462 = vmatprep.mubr.msk.f32.mxu0 %vm618_vm2, %v617_v6  ;;  %v619_v11 = vmov 0   ;;  %v620_v15 = vmov 839922192  }
  0x39   : > { %461 = vmatpush3.xpose.msk.msra.mxu0 %vm230_vm1, %v197_v5  ;;  %v339_v12 = vld [vmem:[%s815_s2] sm:$0xf]  ;;  %v346_v16 = vunpack.c.l.s4 %v620_v15  ;;  %v348_v17 = vlaneseq  ;;  %s457_s9 = sshll.u32 %s663_s16, 7  ;;  %s186_s10 = scalar_lea.vmem [#allocation5], %s447_s30 }
  0x3a   : > { %v193_v3 = vsel %vm191_vm0, %v189_v1, 0.0  ;;  %s370_s11 = sshll.u32 %s186_s10, 4  ;;  %s769_s20 = scalar_lea.hbm %s816_s3, %s457_s9  ;;  %s771_s11 = int_to_ptr.vmem [resolvable:$true] %s370_s11 }
  0x3b   : > { %v194_v4 = vadd.f32 %v193_v3, %v192_v2  ;;  %v347_v18 = vunpack.c.0.s8 %v346_v16  ;;  %v349_v19 = vshrl.u32 %v348_v17, 7  ;;  %s356_s22 = scalar_lea.sflag [#allocation4], %s747_s29  ;;  %s548_s26 = scalar_lea.vmem %s771_s11, 128 }
  0x3c   : > { %p549_p6 = scmp.ne.s32.totalorder %s771_s11, %s548_s26  ;;  %p825_p11 = scmp.ne.s32.totalorder %s820_s24, 0 }
  0x3d   : > { %195 = vadd.xlane.f32.xlu0 %v194_v4  ;;  %v350_v20 = vsub.s32 %v347_v18, %v349_v19  ;;  %s621_s16 = smov [#allocation5]  }
  0x3e   : > { %p550_p12 = pnand %p549_p6, %p825_p11  ;;  %s552_s27 = sshll.u32 %s621_s16, 4  ;;  %s553_s27 = int_to_ptr.vmem [resolvable:$false] %s552_s27 }
  0x3f   : > { %s554_s28 = scalar_lea.vmem %s553_s27, 256  ;;  %p555_p7 = scmp.lt.s32.totalorder %s771_s11, %s553_s27 }
  0x40   : > { %p551_p13 = pneg %p550_p12  ;;  %p556_p10 = scmp.lt.s32.totalorder %s554_s28, %s548_s26 }
  0x42   : > { %p557_p2 = por %p556_p10, %p555_p7 }
  0x44   : > { %p558_p4 = pnand %p557_p2, %p551_p13 }
  0xca   : > { %v196_v7 = vpop.xlane.xlu0 %195 }
  0xcb   : > { %198 = vxpose.xlu0.b32.start.end [1/1] (short) (narrow) %v196_v7, 8 }
  0xf4   : > { %516 = vset.pattern.permute.xlu0 %v619_v11 }
 0x14b   : > { %v214_v8 = vpop.trf.xlu0 }
 0x14c   : > { %463 = vmatmul.mubr.msk.f32.vlgmr.msra.gmra.mrb[0].mxu0 %vm230_vm1, %v214_v8 }
 0x21f   : > { %v303_v9 = vpop.f32.mrb[0].mxu0 }
 0x220   : > { %307 = vxpose.xlu1.b32.start.end [1/1] (short) (narrow) %v303_v9, 8  ;;  %v464_v10 = vpop.f32.mrb[1].mxu0 }
 0x23e   : > { %515 = vset.pattern.permute.xlu1 %v619_v11 }
 0x2a0   : > { %v323_v13 = vpop.trf.xlu1 }
 0x2a1   : > { %v340_v14 = vadd.f32 %v339_v12, %v323_v13 }
 0x2a3   : > { %343 = vperm.xlu1 %515, %v340_v14  }
 0x322   : > { %v344_v21 = vpop.permute.xlu1 %343 }
 0x323   : > { %v351_v22 = vrot.slane %v344_v21, %v350_v20 }
 0x325   : > { %v353_v23 = vmul.f32 %v351_v22, %v187_v0 }
 0x327   : > { %354 = vst [vmem:[%s186_s10] sm:$0xff] %v353_v23 }
 0x328   : > { %561 = shalt.err (!%p558_p4)
}
 0x329   : > { %s562_s29 = scalar_lea.hbm %s769_s20, 128  ;;  %s566_s7 = scalar_lea.hbm %s816_s3, 256 }
 0x32a   : > { %p563_p5 = scmp.ne.s32.totalorder %s769_s20, %s562_s29  ;;  %p567_p0 = scmp.lt.u32.totalorder %s769_s20, %s816_s3 }
 0x32b   : > { %p568_p1 = scmp.lt.u32.totalorder %s566_s7, %s562_s29  ;;  %p570_p6 = scmp.lt.u32.totalorder %s562_s29, %s769_s20 }
 0x32c   : > { %p564_p8 = pnand %p563_p5, %p825_p11 }
 0x32d   : > { %p569_p3 = por %p568_p1, %p567_p0 }
 0x32e   : > { %p565_p9 = pneg %p564_p8 }
 0x32f   : > { %p571_p12 = por %p570_p6, %p569_p3 }
 0x331   : > { %p572_p13 = pnand %p571_p12, %p565_p9 }
 0x333   : > { %575 = shalt.err (!%p572_p13)
}
 0x334   : > { %467 = dma.vmem_to_hbm [thread:$0]  (%p825_p11), %s771_s11, 128, %s769_s20, %s356_s22  }
 0x335 PF: > { %s382_s23 = sand.u32 1, %s602_s12   ;;  %p826_p7 = scmp.ne.s32.totalorder %s821_s25, 0 }
 0x336   : > { %p827_p10 = scmp.ge.s32.totalorder %s614_s15, 2  ;;  %s383_s8 = scalar_lea.sflag [#allocation4], %s382_s23 }
 0x338   : > { %p474_p2 = pnand %p827_p10, %p826_p7 }
 0x33a   : > { %597 = dma.done.wait (!%p474_p2), %s383_s8, 128  }
 0x33b   : > { %599 = vsyncadd (!%p474_p2), %s383_s8, 4294967168  ;;  %p16_p4 = scmp.ge.s32.totalorder %s667_s18, 4   ;;  %s828_s12 = smov %s606_s13 }
 0x33c   : > { %s829_s13 = smov %s610_s14  ;;  %s830_s14 = smov %s679_s21 }
 0x33d   : > { %s831_s15 = smov %s667_s18  ;;  %18 = sbr.rel (!%p16_p4) target bundleno = 5 (0x5), region = 77 }
 0x344   :  { %388 = vsyncpa [#allocation3], 1 }
 0x345   :  { %390 = vsyncpa [#allocation3 + $0x1], 1 }
 0x346   :  { %391 = vsyncpa [#allocation4], 1 }
 0x347   :  { %393 = vsyncpa [#allocation4 + $0x1], 1 }

</bundles_post_ra>
